<compile_context>
chip_gen: v7x
topology: tpu7x:2x2x1
jax: 0.10.0
libtpu: 0.0.40
codegen_flags: <defaults>
</compile_context>

<pallas_src>
import functools

import jax
import jax.numpy as jnp
from jax.experimental import pallas as pl
from jax.experimental.pallas import tpu as pltpu

D_IN, H1, H2, D_OUT = 44, 24, 10, 1

# ---- packed parameter slab layout (single (48, 128) f32 VMEM block) --------
#   rows  0:24 , cols  0:44  -> W1^T  (24, 44)
#   rows  0:24 , col  44     -> b1    (24, 1)
#   rows 24:34 , cols  0:24  -> W2^T  (10, 24)
#   rows 24:34 , col  24     -> b2    (10, 1)
#   rows 24:34 , col  32     -> W3    (10, 1)   (column vector)
#   row  40    , col   0     -> b3    (1, 1)
P_ROWS, P_COLS = 48, 128


def _round_up(v, m):
    return ((v + m - 1) // m) * m


def pack_params(w1, b1, w2, b2, w3, b3):
    """Pack (W1,b1,W2,b2,W3,b3) into one pre-padded f32 slab (done once, host-side)."""
    slab = jnp.zeros((P_ROWS, P_COLS), jnp.float32)
    slab = slab.at[0:24, 0:44].set(w1.T)
    slab = slab.at[0:24, 44:45].set(b1.reshape(H1, 1))
    slab = slab.at[24:34, 0:24].set(w2.T)
    slab = slab.at[24:34, 24:25].set(b2.reshape(H2, 1))
    slab = slab.at[24:34, 32:33].set(w3.reshape(H2, 1))
    slab = slab.at[40:41, 0:1].set(b3.reshape(1, 1))
    return slab


def _mlp_kernel(p_ref, x_ref, o_ref):
    # x tile is streamed untransposed: (tb, 44), batch on the sublane axis.
    x = x_ref[...]

    # Static slices of the resident parameter slab (no extra DMAs).
    w1t = p_ref[0:24, 0:44]      # (24, 44)
    b1 = p_ref[0:24, 44:45]      # (24, 1)
    w2t = p_ref[24:34, 0:24]     # (10, 24)
    b2 = p_ref[24:34, 24:25]     # (10, 1)
    w3c = p_ref[24:34, 32:33]    # (10, 1)
    b3 = p_ref[40:41, 0:1]       # (1, 1)

    # LayerX1: Linear(44 -> 24) + ReLU.
    # Contract both operands on the 44-feature axis: (24,44) x (tb,44) -> (24,tb).
    # The transpose of x is absorbed into the MXU (no wrapper pad/transpose,
    # no in-kernel XLU transpose); batch ends up on the lane axis.
    h1 = jax.lax.dot_general(
        w1t, x, (((1,), (1,)), ((), ())),
        preferred_element_type=jnp.float32) + b1
    h1 = jnp.maximum(h1, 0.0)                                   # (24, tb)

    # LayerX2: Linear(24 -> 10) + ReLU      (MXU, f32 accumulate)
    h2 = jnp.dot(w2t, h1, preferred_element_type=jnp.float32) + b2
    h2 = jnp.maximum(h2, 0.0)                                   # (10, tb)

    # LayerX3: Linear(10 -> 1) + Sigmoid, as VPU multiply + sublane reduce
    # (avoids an M/N=1 MXU matmul).
    h3 = jnp.sum(h2 * w3c, axis=0, keepdims=True) + b3          # (1, tb)
    o_ref[...] = jax.nn.sigmoid(h3)                             # lane-dense store


def my_mode_forward(x, param_slab, *, block_b=4096):
    """Pallas implementation of MyMode.forward (bypass flags all False).

    x          : (B, 44) float32
    param_slab : (48, 128) float32 from pack_params(...)
    returns    : (B, 1) float32
    """
    B = x.shape[0]
    x = x.astype(jnp.float32)

    # Batch tile: always a multiple of 128 (lane width for the output block),
    # capped both by block_b and by ceil(B/2) rounded up to 128 so that the
    # grid keeps >= 2 blocks when the batch is large enough (lets v7x shard the
    # "parallel" batch axis over its two TensorCores; harmless on v5e/v6e).
    block_b = max(128, _round_up(block_b, 128))
    half_cap = max(128, _round_up(pl.cdiv(B, 2), 128))
    tb = min(block_b, half_cap)
    grid_b = pl.cdiv(B, tb)
    b_pad = grid_b * tb

    # VMEM footprint per step (f32): x tile 44*tb*4 (double-buffered) plus
    # ~35*tb*4 of intermediates -> ~1.9 MiB at tb=4096; fits every generation's
    # default scoped VMEM limit, so no vmem_limit_bytes override is needed.
    cost = pl.CostEstimate(
        flops=2 * b_pad * (D_IN * H1 + H1 * H2 + H2 * D_OUT),
        transcendentals=b_pad,  # sigmoid
        bytes_accessed=b_pad * (D_IN + D_OUT) * 4 + P_ROWS * P_COLS * 4,
    )

    out = pl.pallas_call(
        _mlp_kernel,
        out_shape=jax.ShapeDtypeStruct((1, b_pad), jnp.float32),
        grid=(grid_b,),
        in_specs=[
            # Parameter slab: same block every step -> stays resident in VMEM.
            pl.BlockSpec((P_ROWS, P_COLS), lambda i: (0, 0)),
            # x stream: untransposed (tb, 44) blocks straight from HBM,
            # auto double-buffered.  Last dim 44 == full array dim (legal);
            # a partial final block only pollutes discarded output lanes.
            pl.BlockSpec((tb, D_IN), lambda i: (i, 0)),
        ],
        # Lane-dense output block (batch on the lane axis), always full blocks
        # because the output array is padded to b_pad.
        out_specs=pl.BlockSpec((1, tb), lambda i: (0, i)),
        compiler_params=pltpu.CompilerParams(
            dimension_semantics=("parallel",),  # v7x: split batch over 2 TCs
        ),
        cost_estimate=cost,
    )(param_slab, x)

    return out[0, :B].reshape(B, 1)


def init_params(key):
    """Deterministic init mimicking PyTorch's default Linear init
    (uniform(-1/sqrt(fan_in), 1/sqrt(fan_in)))."""
    def linear(key, fan_in, fan_out):
        kw, kb = jax.random.split(key)
        bound = 1.0 / jnp.sqrt(fan_in)
        w = jax.random.uniform(kw, (fan_in, fan_out), jnp.float32, -bound, bound)
        b = jax.random.uniform(kb, (fan_out,), jnp.float32, -bound, bound)
        return w, b

    k1, k2, k3 = jax.random.split(key, 3)
    w1, b1 = linear(k1, D_IN, H1)
    w2, b2 = linear(k2, H1, H2)
    w3, b3 = linear(k3, H2, D_OUT)
    return w1, b1, w2, b2, w3, b3


def reference_forward(x, params):
    """Pure-JAX reference for correctness checking."""
    w1, b1, w2, b2, w3, b3 = params
    h1 = jnp.maximum(x @ w1 + b1, 0.0)
    h2 = jnp.maximum(h1 @ w2 + b2, 0.0)
    return jax.nn.sigmoid(h2 @ w3 + b3)


if __name__ == "__main__":
    key = jax.random.PRNGKey(0)
    kx, kp = jax.random.split(key)

    B = 8
    x = jax.random.normal(kx, (B, D_IN), jnp.float32)
    params = init_params(kp)
    slab = pack_params(*params)

    fwd = jax.jit(functools.partial(my_mode_forward, block_b=4096))
    out = fwd(x, slab)
    out = jax.block_until_ready(out)

    ref = reference_forward(x, params)
    assert out.shape == (B, 1)
    assert jnp.allclose(out, ref, atol=1e-5, rtol=1e-5), "mismatch vs reference"

    print("KERNEL_OK")
</pallas_src>

<mosaic_0001>
module attributes {stable_mosaic.version = 11 : i64} {
  func.func @_mlp_kernel(%arg0: i32, %arg1: memref<48x128xf32, #tpu.memory_space<vmem>>, %arg2: memref<128x44xf32, #tpu.memory_space<vmem>>, %arg3: memref<1x128xf32, #tpu.memory_space<vmem>>) attributes {dimension_semantics = [#tpu.dimension_semantics<parallel>], iteration_bounds = array<i64: 1>, scalar_prefetch = 0 : i64, scratch_operands = 0 : i64, tpu.core_type = #tpu.core_type<tc>, window_params = [{pipeline_mode = #tpu.pipeline_mode<synchronous>, transform_indices = @transform_0, window_bounds = array<i64: 48, 128>}, {transform_indices = @transform_1, window_bounds = array<i64: 128, 44>}, {transform_indices = @transform_2, window_bounds = array<i64: 1, 128>}]} {
    %c0 = arith.constant 0 : index
    %c0_0 = arith.constant 0 : index
    %0 = vector.load %arg2[%c0, %c0_0] : memref<128x44xf32, #tpu.memory_space<vmem>>, vector<128x44xf32>
    %c0_1 = arith.constant 0 : index
    %c0_2 = arith.constant 0 : index
    %1 = vector.load %arg1[%c0_1, %c0_2] : memref<48x128xf32, #tpu.memory_space<vmem>>, vector<24x44xf32>
    %c0_3 = arith.constant 0 : index
    %c44 = arith.constant 44 : index
    %2 = vector.load %arg1[%c0_3, %c44] : memref<48x128xf32, #tpu.memory_space<vmem>>, vector<24x1xf32>
    %c24 = arith.constant 24 : index
    %c0_4 = arith.constant 0 : index
    %3 = vector.load %arg1[%c24, %c0_4] : memref<48x128xf32, #tpu.memory_space<vmem>>, vector<10x24xf32>
    %c24_5 = arith.constant 24 : index
    %c24_6 = arith.constant 24 : index
    %4 = vector.load %arg1[%c24_5, %c24_6] : memref<48x128xf32, #tpu.memory_space<vmem>>, vector<10x1xf32>
    %c24_7 = arith.constant 24 : index
    %c32 = arith.constant 32 : index
    %5 = vector.load %arg1[%c24_7, %c32] : memref<48x128xf32, #tpu.memory_space<vmem>>, vector<10x1xf32>
    %c40 = arith.constant 40 : index
    %c0_8 = arith.constant 0 : index
    %6 = vector.load %arg1[%c40, %c0_8] : memref<48x128xf32, #tpu.memory_space<vmem>>, vector<1x1xf32>
    %cst = arith.constant dense<0.000000e+00> : vector<24x128xf32>
    %7 = tpu.matmul %1, %0, %cst {dimension_numbers = #tpu.dot_dimension_numbers<[1], [1], [0], [0], [0, 0, 1, 0], [], []>} : vector<24x44xf32>, vector<128x44xf32>, vector<24x128xf32> -> vector<24x128xf32>
    %8 = vector.broadcast %2 : vector<24x1xf32> to vector<24x128xf32>
    %9 = arith.addf %7, %8 : vector<24x128xf32>
    %cst_9 = arith.constant 0.000000e+00 : f32
    %10 = vector.broadcast %cst_9 : f32 to vector<24x128xf32>
    %11 = arith.maximumf %9, %10 : vector<24x128xf32>
    %cst_10 = arith.constant dense<0.000000e+00> : vector<10x128xf32>
    %12 = tpu.matmul %3, %11, %cst_10 {dimension_numbers = #tpu.dot_dimension_numbers<[1], [0], [0], [1], [0, 0, 1, 1], [], []>} : vector<10x24xf32>, vector<24x128xf32>, vector<10x128xf32> -> vector<10x128xf32>
    %13 = vector.broadcast %4 : vector<10x1xf32> to vector<10x128xf32>
    %14 = arith.addf %12, %13 : vector<10x128xf32>
    %cst_11 = arith.constant 0.000000e+00 : f32
    %15 = vector.broadcast %cst_11 : f32 to vector<10x128xf32>
    %16 = arith.maximumf %14, %15 : vector<10x128xf32>
    %17 = vector.broadcast %5 : vector<10x1xf32> to vector<10x128xf32>
    %18 = arith.mulf %16, %17 : vector<10x128xf32>
    %cst_12 = arith.constant dense<0.000000e+00> : vector<128xf32>
    %19 = vector.multi_reduction <add>, %18, %cst_12 [0] : vector<10x128xf32> to vector<128xf32>
    %20 = vector.shape_cast %19 : vector<128xf32> to vector<1x128xf32>
    %21 = vector.broadcast %6 : vector<1x1xf32> to vector<1x128xf32>
    %22 = arith.addf %20, %21 : vector<1x128xf32>
    %23 = arith.negf %22 : vector<1x128xf32>
    %24 = math.exp %23 : vector<1x128xf32>
    %cst_13 = arith.constant 1.000000e+00 : f32
    %25 = vector.broadcast %cst_13 : f32 to vector<1x128xf32>
    %26 = arith.addf %25, %24 : vector<1x128xf32>
    %27 = arith.divf %25, %26 : vector<1x128xf32>
    %c0_14 = arith.constant 0 : index
    %c0_15 = arith.constant 0 : index
    %28 = vector.load %arg3[%c0_14, %c0_15] : memref<1x128xf32, #tpu.memory_space<vmem>>, vector<1x128xf32>
    tpu.vector_store %arg3[%c0_14, %c0_15], %27 {strides = array<i32>} : memref<1x128xf32, #tpu.memory_space<vmem>>, vector<1x128xf32>,
    return
  }
  func.func @transform_0(%arg0: i32) -> (i32, i32) {
    %c0_i32 = arith.constant 0 : i32
    %c0_i32_0 = arith.constant 0 : i32
    %c0_i32_1 = arith.constant 0 : i32
    return %c0_i32, %c0_i32_0 : i32, i32
  }
  func.func @transform_1(%arg0: i32) -> (i32, i32) {
    %c0_i32 = arith.constant 0 : i32
    %c0_i32_0 = arith.constant 0 : i32
    return %arg0, %c0_i32 : i32, i32
  }
  func.func @transform_2(%arg0: i32) -> (i32, i32) {
    %c0_i32 = arith.constant 0 : i32
    %c0_i32_0 = arith.constant 0 : i32
    return %c0_i32, %arg0 : i32, i32
  }
}

</mosaic_0001>

<bundles_post_ra>
// kernel: my_mode_forward.1
= control target key start
LH: loop header
LB: loop body
LE: loop exit
PB: predicated region body
PF: predicated region fallthrough
CT: control target
= control target key end

     0   :  { %7 = vsyncpa [#allocation3], 0  ;;  %s628_s0 = inlined_call_operand.hbm [shape: f32[48,128], index: 0, kind: input, shape index: {}]   ;;  %s629_s1 = inlined_call_operand.hbm [shape: f32[8,44], index: 1, kind: input, shape index: {}]   ;;  %s630_s2 = inlined_call_operand.vmem [shape: f32[1,128], index: 2, kind: output, shape index: {}]  }
   0x1   :  { %8 = vsyncpa [#allocation5], 0  ;;  %s545_s9 = smov [#allocation2]   ;;  %s497_s13 = scalar_lea.hbm %s628_s0, 768 }
   0x2   :  { %s14_s10 = sshll.u32 %s545_s9, 4  ;;  %p498_p0 = scmp.ne.s32.totalorder %s628_s0, %s497_s13  ;;  %s15_s10 = int_to_ptr.vmem [resolvable:$true] %s14_s10 }
   0x3   :  { %p501_p1 = scmp.lt.u32.totalorder %s497_s13, %s628_s0 }
   0x5   :  { %p503_p2 = pnand %p501_p1, %p498_p0 }
   0x7   :  { %506 = shalt.err (!%p503_p2)
}
   0x8   :  { %s507_s18 = scalar_lea.vmem %s15_s10, 768  ;;  %p512_p4 = scmp.lt.s32.totalorder %s15_s10, %s15_s10 }
   0x9   :  { %p508_p3 = scmp.ne.s32.totalorder %s15_s10, %s507_s18  ;;  %p513_p5 = scmp.lt.s32.totalorder %s507_s18, %s507_s18 }
   0xb   :  { %p514_p6 = por %p513_p5, %p512_p4 }
   0xd   :  { %p515_p7 = pnand %p514_p6, %p508_p3 }
   0xf   :  { %518 = shalt.err (!%p515_p7)
}
  0x10   :  { %s546_s19 = smov 128   ;;  %s547_s20 = smov 8  }
  0x11   :  { %20 = dma.hbm_to_vmem [thread:$0]  %s628_s0, 768, %s15_s10, [#allocation3], %s546_s19, %s546_s19, %s547_s20  }
  0x12   :  { %25 = vsyncadd [#allocation5], 1920  ;;  %s548_s23 = smov [#allocation4]   ;;  %s519_s27 = scalar_lea.hbm %s629_s1, 128 }
  0x13   :  { %s26_s24 = sshll.u32 %s548_s23, 4  ;;  %p520_p8 = scmp.ne.s32.totalorder %s629_s1, %s519_s27  ;;  %s27_s24 = int_to_ptr.vmem [resolvable:$true] %s26_s24 }
  0x14   :  { %p523_p9 = scmp.lt.u32.totalorder %s519_s27, %s629_s1 }
  0x16   :  { %p525_p10 = pnand %p523_p9, %p520_p8 }
  0x18   :  { %528 = shalt.err (!%p525_p10)
}
  0x19   :  { %s529_s4 = scalar_lea.vmem %s27_s24, 128  ;;  %s533_s0 = scalar_lea.vmem %s27_s24, 2048 }
  0x1a   :  { %p530_p11 = scmp.ne.s32.totalorder %s27_s24, %s529_s4  ;;  %p534_p12 = scmp.lt.s32.totalorder %s27_s24, %s27_s24 }
  0x1b   :  { %p535_p13 = scmp.lt.s32.totalorder %s533_s0, %s529_s4 }
  0x1d   :  { %p536_p0 = por %p535_p13, %p534_p12 }
  0x1f   :  { %p537_p1 = pnand %p536_p0, %p530_p11 }
  0x21   :  { %540 = shalt.err (!%p537_p1)
}
  0x22   :  { %32 = dma.hbm_to_vmem [thread:$0]  %s629_s1, 128, %s27_s24, [#allocation5], %s546_s19, %s546_s19, %s547_s20  }
  0x23   :  { %541 = dma.done.wait [#allocation3], 768  }
  0x24   :  { %542 = vsyncadd [#allocation3], 4294966528 }
  0x25   :  { %543 = dma.done.wait [#allocation5], 2048  }
  0x26   :  { %544 = vsyncadd [#allocation5], 4294965248  ;;  %v549_v0 = vmov 0.0|0.0   ;;  %vm550_vm0 = vmmov 0   ;;  %v551_v1 = vmov 0.0   ;;  %v552_v2 = vmov 44  }
  0x27   :  { %440 = vmatprep.subr.bf16.mxu0 %v549_v0  ;;  %422 = vmatprep.mubr.msk.f32.mxu0 %vm550_vm0, %v551_v1  ;;  %vm76_vm1 = vcmask 359424   ;;  %v39_v3 = vld [vmem:[#allocation4] sm:$0xff]  ;;  %v40_v4 = vld [vmem:[#allocation4 + $0x8] sm:$0xff]  ;;  %v41_v7 = vld [vmem:[#allocation4 + $0x10] sm:$0xff]  ;;  %vm224_vm3 = vcmask 195584   ;;  %v553_v33 = vmov 24  }
  0x28   :  { %487 = vset.pattern.permute.xlu0 %v552_v2  ;;  %488 = vset.pattern.permute.xlu1 %v552_v2  ;;  %vm598_vm2 = vmpackc.low %vm76_vm1, %vm76_vm1  ;;  %v441_v6 = vpack.c.bf16 %v40_v4, %v39_v3  ;;  %v42_v8 = vld [vmem:[#allocation4 + $0x18] sm:$0xff]  ;;  %v55_v9 = vld [vmem:[#allocation2] sm:$0xff]  ;;  %v554_v35 = vmov 32   ;;  %v555_v36 = vmov 0   ;;  %vm316_vm4 = vcmask 1041408  }
  0x29   :  { %v57_v10 = vld [vmem:[#allocation2 + $0x10] sm:$0xff]  ;;  %63 = vperm.xlu0 %487, %v55_v9   ;;  %v445_v11 = vpack.c.bf16 %v42_v8, %v41_v7  ;;  %v56_v12 = vld [vmem:[#allocation2 + $0x8] sm:$0xff]  ;;  %v44_v14 = vld [vmem:[#allocation4 + $0x28] sm:$0xff] }
  0x2a   :  { %443 = vmatpush3.bf16.xpose.msk.msra.mxu0 %vm598_vm2, %v441_v6  ;;  %73 = vperm.xlu1 %488, %v57_v10   ;;  %v43_v13 = vld [vmem:[#allocation4 + $0x20] sm:$0xff]  ;;  %v45_v16 = vld [vmem:[#allocation4 + $0x30] sm:$0xff]  ;;  %v46_v17 = vld [vmem:[#allocation4 + $0x38] sm:$0xff] }
  0x2b   :  { %444 = vmatprep.subr.bf16.mxu0 %v549_v0  ;;  %v449_v15 = vpack.c.bf16 %v44_v14, %v43_v13  ;;  %v453_v18 = vpack.c.bf16 %v46_v17, %v45_v16  ;;  %v47_v19 = vld [vmem:[#allocation4 + $0x40] sm:$0xff]  ;;  %v48_v20 = vld [vmem:[#allocation4 + $0x48] sm:$0xff]  ;;  %v49_v22 = vld [vmem:[#allocation4 + $0x50] sm:$0xff] }
  0x2c   :  { %v457_v21 = vpack.c.bf16 %v48_v20, %v47_v19  ;;  %v50_v23 = vld [vmem:[#allocation4 + $0x58] sm:$0xff]  ;;  %v51_v25 = vld [vmem:[#allocation4 + $0x60] sm:$0xff]  ;;  %v52_v26 = vld [vmem:[#allocation4 + $0x68] sm:$0xff] }
  0x2d   :  { %68 = vperm.xlu0 %487, %v56_v12   ;;  %v461_v24 = vpack.c.bf16 %v50_v23, %v49_v22  ;;  %v465_v27 = vpack.c.bf16 %v52_v26, %v51_v25  ;;  %v53_v28 = vld [vmem:[#allocation4 + $0x70] sm:$0xff]  ;;  %v54_v29 = vld [vmem:[#allocation4 + $0x78] sm:$0xff]  ;;  %v58_v31 = vld [vmem:[#allocation2 + $0x18] sm:$0xff] }
  0x2e   :  { %v469_v30 = vpack.c.bf16 %v54_v29, %v53_v28  ;;  %437 = vmatprep.mubr.msk.f32.mxu1 %vm224_vm3, %v58_v31  ;;  %v59_v32 = vld [vmem:[#allocation2 + $0x20] sm:$0x3]  ;;  %489 = vset.pattern.permute.xlu1 %v553_v33  ;;  %v60_v34 = vld [vmem:[#allocation2 + $0x28] sm:$0x1] }
  0x2f   :  { %221 = vperm.xlu1 %489, %v59_v32  }
  0x31   :  { %490 = vset.pattern.permute.xlu0 %v553_v33 }
  0x32   :  { %447 = vmatpush3.bf16.xpose.msk.msra.mxu0 %vm598_vm2, %v445_v11  ;;  %216 = vperm.xlu0 %490, %v58_v31  }
  0x33   :  { %448 = vmatprep.subr.bf16.mxu0 %v549_v0  ;;  %491 = vset.pattern.permute.xlu1 %v554_v35 }
  0x34   :  { %311 = vperm.xlu1 %491, %v59_v32  }
  0x36   :  { %492 = vset.pattern.permute.xlu0 %v555_v36 }
  0x37   :  { %327 = vperm.xlu0 %492, %v60_v34  }
  0x38   :  { %307 = vperm.xlu1 %491, %v58_v31  }
  0x3a   :  { %451 = vmatpush3.bf16.xpose.msk.msra.mxu0 %vm598_vm2, %v449_v15 }
  0x3b   :  { %452 = vmatprep.subr.bf16.mxu0 %v549_v0 }
  0x42   :  { %455 = vmatpush3.bf16.xpose.msk.msra.mxu0 %vm598_vm2, %v453_v18 }
  0x43   :  { %456 = vmatprep.subr.bf16.mxu0 %v549_v0 }
  0x4a   :  { %459 = vmatpush3.bf16.xpose.msk.msra.mxu0 %vm598_vm2, %v457_v21 }
  0x4b   :  { %460 = vmatprep.subr.bf16.mxu0 %v549_v0 }
  0x52   :  { %463 = vmatpush3.bf16.xpose.msk.msra.mxu0 %vm598_vm2, %v461_v24 }
  0x53   :  { %464 = vmatprep.subr.bf16.mxu0 %v549_v0 }
  0x5a   :  { %467 = vmatpush3.bf16.xpose.msk.msra.mxu0 %vm598_vm2, %v465_v27 }
  0x5b   :  { %468 = vmatprep.subr.bf16.mxu0 %v549_v0 }
  0x62   :  { %471 = vmatpush3.bf16.xpose.msk.msra.mxu0 %vm598_vm2, %v469_v30 }
  0x69   :  { %423 = vmatmul.mubr.msk.f32.vlgmr.msra.gmra.mrb[0].mxu0 %vm76_vm1, %v55_v9 }
  0x6a   :  { %425 = vmatprep.mubr.msk.f32.mxu0 %vm550_vm0, %v551_v1 }
  0x6d   :  { %426 = vmatmul.mubr.msk.f32.gmra.mrb[2].mxu0 %vm76_vm1, %v56_v12 }
  0x6e   :  { %428 = vmatprep.mubr.msk.f32.mxu0 %vm550_vm0, %v551_v1 }
  0x71   :  { %429 = vmatmul.mubr.msk.f32.gmra.mrb[4].mxu0 %vm76_vm1, %v57_v10 }
  0xa8   :  { %v64_v37 = vpop.permute.xlu0 %63 }
  0xa9   :  { %v74_v45 = vpop.permute.xlu1 %73 }
  0xac   :  { %v69_v41 = vpop.permute.xlu0 %68 }
  0xae   :  { %v222_v53 = vpop.permute.xlu1 %221 }
  0xb1   :  { %v217_v55 = vpop.permute.xlu0 %216 }
  0xb3   :  { %v312_v54 = vpop.permute.xlu1 %311 }
  0xb6   :  { %v328_v8 = vpop.permute.xlu0 %327 }
  0xb7   :  { %v308_v63 = vpop.permute.xlu1 %307 }
 0x13c   :  { %v197_v38 = vpop.f32.mrb[0].mxu0 }
 0x13d   :  { %v424_v39 = vpop.f32.mrb[1].mxu0  ;;  %v198_v40 = vadd.f32 %v197_v38, %v64_v37 }
 0x13f   :  { %v211_v46 = vmax.f32 %v198_v40, 0.0 }
 0x140   :  { %v202_v42 = vpop.f32.mrb[2].mxu0 }
 0x141   :  { %v203_v43 = vadd.f32 %v202_v42, %v69_v41  ;;  %v427_v44 = vpop.f32.mrb[3].mxu0 }
 0x143   :  { %v212_v47 = vmax.f32 %v203_v43, 0.0 }
 0x144   :  { %v207_v48 = vpop.f32.mrb[4].mxu0 }
 0x145   :  { %v208_v49 = vadd.f32 %v207_v48, %v74_v45  ;;  %v430_v50 = vpop.f32.mrb[5].mxu0  ;;  %v472_v51 = vpack.c.bf16 %v212_v47, %v211_v46 }
 0x147   :  { %v213_v52 = vmax.f32 %v208_v49, 0.0  ;;  %473 = vmatprep.subr.bf16.mxu1 %v472_v51 }
 0x148   :  { %475 = vmatpush3.bf16.msra.mxu1 %v472_v51 }
 0x149   :  { %435 = vmatprep.subr.mxu1 %v213_v52 }
 0x14c   :  { %436 = vmatpush3.msra.mxu1 %v213_v52 }
 0x14d   :  { %438 = vmatmul.mubr.msk.f32.vlgmr.msra.gmra.mrb[0].mxu1 %vm224_vm3, %v59_v32 }
 0x220   :  { %v439_v56 = vpop.f32.mrb[0].mxu1 }
 0x221   :  { %v301_v57 = vadd.f32 %v439_v56, %v222_v53  ;;  %v295_v58 = vpop.f32.mrb[1].mxu1 }
 0x222   :  { %v296_v59 = vadd.f32 %v295_v58, %v217_v55 }
 0x223   :  { %v305_v60 = vmax.f32 %v301_v57, 0.0 }
 0x224   :  { %v304_v61 = vmax.f32 %v296_v59, 0.0 }
 0x225   :  { %v315_v62 = vmul.f32 %v312_v54, %v305_v60 }
 0x226   :  { %v314_v0 = vmul.f32 %v308_v63, %v304_v61 }
 0x227   :  { %v317_v1 = vsel %vm316_vm4, %v315_v62, 0.0 }
 0x228   :  { %v318_v2 = vadd.f32 %v317_v1, %v314_v0 }
 0x22a   :  { %v319_v3 = vrot.slane %v318_v2, 4 }
 0x22c   :  { %v320_v4 = vadd.f32 %v319_v3, %v318_v2 }
 0x22e   :  { %v321_v5 = vrot.slane %v320_v4, 2 }
 0x230   :  { %v322_v6 = vadd.f32 %v321_v5, %v320_v4 }
 0x232   :  { %v323_v7 = vrot.slane %v322_v6, 1 }
 0x234   :  { %v324_v9 = vadd.f32 %v323_v7, %v322_v6 }
 0x236   :  { %v330_v10 = vadd.f32 %v328_v8, %v324_v9 }
 0x238   :  { %v365_v11 = vmul.f32 -1.442695, %v330_v10 }
 0x23a   :  { %493 = vpow2.f32 %v365_v11 }
 0x244   :  { %v494_v12 = vpop.eup %493 }
 0x245   :  { %v334_v13 = vadd.f32 1.0, %v494_v12 }
 0x247   :  { %495 = vrcp.f32 %v334_v13 }
 0x251   :  { %v496_v14 = vpop.eup %495 }
 0x252   :  { %337 = vst [vmem:[%s630_s2] sm:$0x1] %v496_v14 }
 0x253   :  { %342 = vsyncpa [#allocation3], 1 }
 0x254   :  { %343 = vsyncpa [#allocation5], 1 }

</bundles_post_ra>
